<compile_context>
chip_gen: v7x
topology: tpu7x:2x2x1
jax: 0.10.0
libtpu: 0.0.40
codegen_flags: <defaults>
</compile_context>

<pallas_src>
import jax
import jax.numpy as jnp
from jax import lax
from jax.experimental import pallas as pl
from jax.experimental.pallas import tpu as pltpu


def _round_up(x, m):
    return (x + m - 1) // m * m


# ----------------------------- in-kernel helpers (trace-time) -----------------------------
def _conv3_valid(vb, w_cat, b):
    """Height-3 'valid' conv (conv_region) as ONE MXU matmul.

    vb:    (H, Bb, C) bf16
    w_cat: (3*C, F)   bf16, taps stacked row-major in window order (top, mid, bottom)
    b:     (1, F)     f32
    returns (H-2, Bb, F) f32
    """
    H, Bb, C = vb.shape
    F = w_cat.shape[1]
    Hout = H - 2
    win = jnp.concatenate([vb[0:Hout], vb[1:Hout + 1], vb[2:Hout + 2]], axis=-1)
    out = jnp.dot(win.reshape(Hout * Bb, 3 * C), w_cat,
                  preferred_element_type=jnp.float32) + b
    return out.reshape(Hout, Bb, F)


def _conv3_same_relu(v, w_cat, b):
    """padding1 (zero row top+bottom) + ReLU + height-3 conv as ONE MXU matmul.

    ReLU and the bf16 cast happen once, BEFORE the 3-window concat, so the im2col
    copies move bf16 bytes; the pad rows are folded into the first/last window
    slice (no materialized padded copy of the activation).

    v: (H, Bb, C) f32 -> (H, Bb, F) f32
    """
    H, Bb, C = v.shape
    F = w_cat.shape[1]
    vb = jnp.maximum(v, 0.0).astype(jnp.bfloat16)           # relu once, cast once
    zero = jnp.zeros((1, Bb, C), jnp.bfloat16)
    if H > 1:
        top = jnp.concatenate([zero, vb[:H - 1]], axis=0)   # row i-1 (zero at i=0)
        bot = jnp.concatenate([vb[1:], zero], axis=0)       # row i+1 (zero at i=H-1)
    else:
        top = zero
        bot = zero
    win = jnp.concatenate([top, vb, bot], axis=-1)           # (H, Bb, 3C) bf16
    out = jnp.dot(win.reshape(H * Bb, 3 * C), w_cat,
                  preferred_element_type=jnp.float32) + b
    return out.reshape(H, Bb, F)


def _maxpool3_s2(v):
    """padding2 (one zero row at the bottom) + MaxPool2d(kernel=(3,1), stride=2).

    Vectorized: two whole-tensor maxima over unit-stride shifted slices, then keep
    every other row via a layout-free leading-axis reshape + static slice.
    v: (H, Bb, C) f32 -> ((H-2)//2 + 1, Bb, C) f32
    """
    H, Bb, C = v.shape
    hout = (H - 2) // 2 + 1
    zero = jnp.zeros((1, Bb, C), v.dtype)
    vp = jnp.concatenate([v, zero], axis=0)                       # (H+1, Bb, C)
    m = jnp.maximum(jnp.maximum(vp[0:H - 1], vp[1:H]), vp[2:H + 1])  # (H-1, Bb, C)
    if (H - 1) % 2:                                               # pad to even row count
        m = jnp.concatenate([m, zero], axis=0)
    return m.reshape(hout, 2, Bb, C)[:, 0]                        # rows 0, 2, 4, ...


# --------------------------------- fused DPCNN kernel ---------------------------------
def _dpcnn_fused_kernel(x_ref, wr_ref, br_ref, wc_ref, bc_ref, wfc_ref, bfc_ref, o_ref):
    wr = wr_ref[...]          # (3*C, F) bf16   conv_region weight (im2col-stacked)
    br = br_ref[...]          # (1, F)   f32
    wc = wc_ref[...]          # (3*F, F) bf16   conv weight (im2col-stacked)
    bc = bc_ref[...]          # (1, F)   f32

    x = _conv3_valid(x_ref[...], wr, br)        # conv_region           (L-2, Bb, F)
    x = _conv3_same_relu(x, wc, bc)             # padding1 + relu + conv
    x = _conv3_same_relu(x, wc, bc)             # padding1 + relu + conv

    # while x.size(2) > 2: _block(x)  — static shapes, unrolls at trace time.
    while x.shape[0] > 2:
        px = _maxpool3_s2(x)                    # padding2 + max_pool(3, stride 2)
        y = _conv3_same_relu(px, wc, bc)
        y = _conv3_same_relu(y, wc, bc)
        x = y + px                              # residual (f32)

    # Pyramid height == 1 is validated in the wrapper before tracing.
    feat = x[0].astype(jnp.bfloat16)            # (Bb, F)
    o_ref[...] = (jnp.dot(feat, wfc_ref[...], preferred_element_type=jnp.float32)
                  + bfc_ref[...]).astype(o_ref.dtype)        # (Bb, Cpad) lane-dense


# ------------------------------------ tiling ------------------------------------
def _pick_tiling(B, L, C, F):
    """Pick a sublane-aligned batch tile Bb and a padded batch Bpad (Bb | Bpad).

    Bb is as large as a conservative VMEM budget allows (fat MXU M dim, few grid
    steps / less fixed per-step overhead), then halved once if that gives the grid
    >= 2 steps so the 'parallel' batch axis can shard across v7x's two TensorCores.
    """
    # Per-batch-row VMEM estimate (bytes) at the peak same-conv stage: f32 activation
    # + bf16 relu copy + bf16 im2col window + f32 conv output, plus the
    # double-buffered (L, Bb, C) bf16 input block.
    per_row = L * (4 * max(C, F) + 2 * max(C, F) + 2 * 3 * C + 4 * F + 2 * 2 * C)
    budget = 40 * 1024 * 1024          # headroom inside v7x's 64 MiB physical VMEM
    bb = 256
    while bb > 8 and bb * per_row > budget:
        bb //= 2
    b8 = _round_up(B, 8)
    while bb > 8 and bb > b8:          # don't over-pad small batches
        bb //= 2
    bpad = _round_up(b8, bb)
    if bpad // bb < 2 and bb > 8:      # >= 2 grid steps -> keep both v7x TCs busy
        bb //= 2
    return bb, bpad


# ------------------------------------ wrapper ------------------------------------
def dpcnn_forward(input_ids, params):
    emb = params["embedding"]
    B, L = input_ids.shape
    C = emb.shape[1]
    F = params["w_region"].shape[2]
    n_charge = params["w_fc"].shape[1]
    Cpad = _round_up(n_charge, 128)    # lane-dense fc output tile

    # The PyTorch model requires the pool pyramid to terminate at height 1
    # (otherwise its squeeze() -> Linear(num_filters, ...) crashes); validate here
    # with a clear error instead of an opaque in-kernel assert.
    h = L - 2
    while h > 2:
        h = (h - 2) // 2 + 1
    if h != 1:
        raise ValueError(
            f"DPCNN pool pyramid for seq_len={L} terminates at height {h} != 1; "
            f"the reference PyTorch module fails for this length as well.")
    # TODO(synk): a 'final pool over the remaining 2 rows' variant would need a
    # matching change in the PyTorch model; it is not part of the current spec.

    Bb, Bpad = _pick_tiling(B, L, C, F)

    # Embedding gather straight into the (H, B, C) kernel layout (plain-JAX glue:
    # one XLA gather feeding the fused kernel), batch zero-padded to Bpad.
    x = jnp.take(emb, input_ids.T, axis=0).astype(jnp.bfloat16)      # (L, B, C)
    if Bpad != B:
        x = jnp.concatenate([x, jnp.zeros((L, Bpad - B, C), x.dtype)], axis=1)

    # im2col-stacked conv weights (bf16) + f32 biases; fc padded to Cpad lanes.
    wr = params["w_region"].reshape(3 * C, F).astype(jnp.bfloat16)
    wc = params["w_conv"].reshape(3 * F, F).astype(jnp.bfloat16)
    br = params["b_region"].reshape(1, F).astype(jnp.float32)
    bc = params["b_conv"].reshape(1, F).astype(jnp.float32)
    wfc = jnp.zeros((F, Cpad), jnp.bfloat16).at[:, :n_charge].set(
        params["w_fc"].astype(jnp.bfloat16))
    bfc = jnp.zeros((1, Cpad), jnp.float32).at[0, :n_charge].set(
        params["b_fc"].astype(jnp.float32))

    grid = (Bpad // Bb,)
    # NOTE: the ~230 KB of constant weights are double-buffered by default; single-
    # buffering them (pipeline_mode=pl.Buffered(1)) would free <1% of the VMEM limit
    # below, so it is intentionally left out in favour of guaranteed-clean lowering.
    out = pl.pallas_call(
        _dpcnn_fused_kernel,
        out_shape=jax.ShapeDtypeStruct((Bpad, Cpad), jnp.float32),
        grid=grid,
        in_specs=[
            pl.BlockSpec((L, Bb, C), lambda i: (0, i, 0)),      # embedded tokens
            pl.BlockSpec((3 * C, F), lambda i: (0, 0)),         # conv_region weight
            pl.BlockSpec((1, F), lambda i: (0, 0)),             # conv_region bias
            pl.BlockSpec((3 * F, F), lambda i: (0, 0)),         # conv weight
            pl.BlockSpec((1, F), lambda i: (0, 0)),             # conv bias
            pl.BlockSpec((F, Cpad), lambda i: (0, 0)),          # fc weight (padded)
            pl.BlockSpec((1, Cpad), lambda i: (0, 0)),          # fc bias (padded)
        ],
        out_specs=pl.BlockSpec((Bb, Cpad), lambda i: (i, 0)),
        compiler_params=pltpu.CompilerParams(
            dimension_semantics=("parallel",),
            # above the 16/32 MiB default scoped limits, below v7x's 64 MiB physical
            vmem_limit_bytes=48 * 1024 * 1024),
    )(x, wr, br, wc, bc, wfc, bfc)
    return out[:B, :n_charge]


# ------------------------------- pure-JAX reference --------------------------------
def dpcnn_reference(input_ids, params):
    x = jnp.take(params["embedding"], input_ids, axis=0)[:, None, :, :]        # NCHW
    w_region = jnp.transpose(params["w_region"], (2, 0, 1))[:, None, :, :]     # [F,1,3,D]
    w_conv = jnp.transpose(params["w_conv"], (2, 1, 0))[:, :, :, None]         # [F,F,3,1]
    dn = ("NCHW", "OIHW", "NCHW")

    def conv(y, w, b):
        y = lax.conv_general_dilated(y, w, (1, 1), "VALID", dimension_numbers=dn)
        return y + b[None, :, None, None]

    def pad1(y):
        return jnp.pad(y, ((0, 0), (0, 0), (1, 1), (0, 0)))

    def pad2(y):
        return jnp.pad(y, ((0, 0), (0, 0), (0, 1), (0, 0)))

    x = conv(x, w_region, params["b_region"])
    x = conv(jnp.maximum(pad1(x), 0.0), w_conv, params["b_conv"])
    x = conv(jnp.maximum(pad1(x), 0.0), w_conv, params["b_conv"])
    while x.shape[2] > 2:
        px = lax.reduce_window(pad2(x), -jnp.inf, lax.max,
                               (1, 1, 3, 1), (1, 1, 2, 2), "VALID")
        x = conv(jnp.maximum(pad1(px), 0.0), w_conv, params["b_conv"])
        x = conv(jnp.maximum(pad1(x), 0.0), w_conv, params["b_conv"])
        x = x + px
    x = jnp.squeeze(x)
    return x @ params["w_fc"] + params["b_fc"]


if __name__ == "__main__":
    # Small synthetic config (emb_dim == hid_dim, as in the module defaults).
    vocab_size = 64
    emb_dim = hid_dim = 128            # num_filters = emb_dim
    n_charge = 8                       # len(maps['charge2idx'])
    B, L = 2, 8                        # H: 6 -> 3 -> 1 through the repeated _block

    key = jax.random.PRNGKey(0)
    k = jax.random.split(key, 8)
    params = {
        "embedding": jax.random.normal(k[0], (vocab_size, emb_dim), jnp.float32) * 0.1,
        # conv_region torch weight [F, 1, 3, hid_dim] stored as [kh=3, hid_dim, F]
        "w_region": jax.random.normal(k[1], (3, hid_dim, emb_dim), jnp.float32)
                    * (1.0 / (3 * hid_dim) ** 0.5),
        "b_region": jax.random.normal(k[2], (emb_dim,), jnp.float32) * 0.01,
        # conv torch weight [F, F, 3, 1] stored as [kh=3, C=F, F]
        "w_conv": jax.random.normal(k[3], (3, emb_dim, emb_dim), jnp.float32)
                  * (1.0 / (3 * emb_dim) ** 0.5),
        "b_conv": jax.random.normal(k[4], (emb_dim,), jnp.float32) * 0.01,
        # fc_charge torch weight [n_charge, F] stored as [F, n_charge]
        "w_fc": jax.random.normal(k[5], (emb_dim, n_charge), jnp.float32)
                * (1.0 / emb_dim ** 0.5),
        "b_fc": jax.random.normal(k[6], (n_charge,), jnp.float32) * 0.01,
    }
    input_ids = jax.random.randint(k[7], (B, L), 0, vocab_size, jnp.int32)

    fwd = jax.jit(dpcnn_forward)
    out = jax.block_until_ready(fwd(input_ids, params))
    ref = jax.block_until_ready(dpcnn_reference(input_ids, params))

    assert out.shape == (B, n_charge)
    # Kernel uses bf16 MXU matmuls (f32 accumulation) vs an all-f32 reference,
    # hence the looser tolerance (documented accuracy contract).
    assert jnp.allclose(out, ref, atol=5e-2, rtol=5e-2), \
        f"max abs diff {float(jnp.max(jnp.abs(out - ref)))}"

    print("KERNEL_OK")
</pallas_src>

<mosaic_0001>
module attributes {stable_mosaic.version = 11 : i64} {
  func.func @_dpcnn_fused_kernel(%arg0: i32, %arg1: memref<8x8x128xbf16, #tpu.memory_space<vmem>>, %arg2: memref<384x128xbf16, #tpu.memory_space<vmem>>, %arg3: memref<1x128xf32, #tpu.memory_space<vmem>>, %arg4: memref<384x128xbf16, #tpu.memory_space<vmem>>, %arg5: memref<1x128xf32, #tpu.memory_space<vmem>>, %arg6: memref<128x128xbf16, #tpu.memory_space<vmem>>, %arg7: memref<1x128xf32, #tpu.memory_space<vmem>>, %arg8: memref<8x128xf32, #tpu.memory_space<vmem>>) attributes {dimension_semantics = [#tpu.dimension_semantics<parallel>], iteration_bounds = array<i64: 1>, scalar_prefetch = 0 : i64, scratch_operands = 0 : i64, tpu.core_type = #tpu.core_type<tc>, window_params = [{transform_indices = @transform_0, window_bounds = array<i64: 8, 8, 128>}, {pipeline_mode = #tpu.pipeline_mode<synchronous>, transform_indices = @transform_1, window_bounds = array<i64: 384, 128>}, {pipeline_mode = #tpu.pipeline_mode<synchronous>, transform_indices = @transform_2, window_bounds = array<i64: 1, 128>}, {pipeline_mode = #tpu.pipeline_mode<synchronous>, transform_indices = @transform_3, window_bounds = array<i64: 384, 128>}, {pipeline_mode = #tpu.pipeline_mode<synchronous>, transform_indices = @transform_4, window_bounds = array<i64: 1, 128>}, {pipeline_mode = #tpu.pipeline_mode<synchronous>, transform_indices = @transform_5, window_bounds = array<i64: 128, 128>}, {pipeline_mode = #tpu.pipeline_mode<synchronous>, transform_indices = @transform_6, window_bounds = array<i64: 1, 128>}, {transform_indices = @transform_7, window_bounds = array<i64: 8, 128>}]} {
    %c0 = arith.constant 0 : index
    %c0_0 = arith.constant 0 : index
    %0 = vector.load %arg2[%c0, %c0_0] : memref<384x128xbf16, #tpu.memory_space<vmem>>, vector<384x128xbf16>
    %c0_1 = arith.constant 0 : index
    %c0_2 = arith.constant 0 : index
    %1 = vector.load %arg3[%c0_1, %c0_2] : memref<1x128xf32, #tpu.memory_space<vmem>>, vector<1x128xf32>
    %c0_3 = arith.constant 0 : index
    %c0_4 = arith.constant 0 : index
    %2 = vector.load %arg4[%c0_3, %c0_4] : memref<384x128xbf16, #tpu.memory_space<vmem>>, vector<384x128xbf16>
    %c0_5 = arith.constant 0 : index
    %c0_6 = arith.constant 0 : index
    %3 = vector.load %arg5[%c0_5, %c0_6] : memref<1x128xf32, #tpu.memory_space<vmem>>, vector<1x128xf32>
    %c0_7 = arith.constant 0 : index
    %c0_8 = arith.constant 0 : index
    %c0_9 = arith.constant 0 : index
    %4 = vector.load %arg1[%c0_7, %c0_8, %c0_9] : memref<8x8x128xbf16, #tpu.memory_space<vmem>>, vector<8x8x128xbf16>
    %5 = vector.extract_strided_slice %4 {offsets = [0, 0, 0], sizes = [6, 8, 128], strides = [1, 1, 1]} : vector<8x8x128xbf16> to vector<6x8x128xbf16>
    %6 = vector.extract_strided_slice %4 {offsets = [1, 0, 0], sizes = [6, 8, 128], strides = [1, 1, 1]} : vector<8x8x128xbf16> to vector<6x8x128xbf16>
    %7 = vector.extract_strided_slice %4 {offsets = [2, 0, 0], sizes = [6, 8, 128], strides = [1, 1, 1]} : vector<8x8x128xbf16> to vector<6x8x128xbf16>
    %8 = tpu.concatenate %5, %6, %7 in 2 : vector<6x8x128xbf16>, vector<6x8x128xbf16>, vector<6x8x128xbf16> -> vector<6x8x384xbf16>
    %9 = vector.shape_cast %8 : vector<6x8x384xbf16> to vector<48x384xbf16>
    %cst = arith.constant dense<0.000000e+00> : vector<48x128xf32>
    %10 = tpu.matmul %9, %0, %cst {dimension_numbers = #tpu.dot_dimension_numbers<[1], [0], [0], [1], [0, 0, 1, 1], [], []>} : vector<48x384xbf16>, vector<384x128xbf16>, vector<48x128xf32> -> vector<48x128xf32>
    %11 = vector.broadcast %1 : vector<1x128xf32> to vector<48x128xf32>
    %12 = arith.addf %10, %11 : vector<48x128xf32>
    %13 = vector.shape_cast %12 : vector<48x128xf32> to vector<6x8x128xf32>
    %cst_10 = arith.constant 0.000000e+00 : f32
    %14 = vector.broadcast %cst_10 : f32 to vector<6x8x128xf32>
    %15 = arith.maximumf %13, %14 : vector<6x8x128xf32>
    %16 = arith.truncf %15 : vector<6x8x128xf32> to vector<6x8x128xbf16>
    %cst_11 = arith.constant 0.000000e+00 : bf16
    %17 = vector.broadcast %cst_11 : bf16 to vector<1x8x128xbf16>
    %18 = vector.extract_strided_slice %16 {offsets = [0, 0, 0], sizes = [5, 8, 128], strides = [1, 1, 1]} : vector<6x8x128xbf16> to vector<5x8x128xbf16>
    %19 = tpu.concatenate %17, %18 in 0 : vector<1x8x128xbf16>, vector<5x8x128xbf16> -> vector<6x8x128xbf16>
    %20 = vector.extract_strided_slice %16 {offsets = [1, 0, 0], sizes = [5, 8, 128], strides = [1, 1, 1]} : vector<6x8x128xbf16> to vector<5x8x128xbf16>
    %21 = tpu.concatenate %20, %17 in 0 : vector<5x8x128xbf16>, vector<1x8x128xbf16> -> vector<6x8x128xbf16>
    %22 = tpu.concatenate %19, %16, %21 in 2 : vector<6x8x128xbf16>, vector<6x8x128xbf16>, vector<6x8x128xbf16> -> vector<6x8x384xbf16>
    %23 = vector.shape_cast %22 : vector<6x8x384xbf16> to vector<48x384xbf16>
    %cst_12 = arith.constant dense<0.000000e+00> : vector<48x128xf32>
    %24 = tpu.matmul %23, %2, %cst_12 {dimension_numbers = #tpu.dot_dimension_numbers<[1], [0], [0], [1], [0, 0, 1, 1], [], []>} : vector<48x384xbf16>, vector<384x128xbf16>, vector<48x128xf32> -> vector<48x128xf32>
    %25 = vector.broadcast %3 : vector<1x128xf32> to vector<48x128xf32>
    %26 = arith.addf %24, %25 : vector<48x128xf32>
    %27 = vector.shape_cast %26 : vector<48x128xf32> to vector<6x8x128xf32>
    %cst_13 = arith.constant 0.000000e+00 : f32
    %28 = vector.broadcast %cst_13 : f32 to vector<6x8x128xf32>
    %29 = arith.maximumf %27, %28 : vector<6x8x128xf32>
    %30 = arith.truncf %29 : vector<6x8x128xf32> to vector<6x8x128xbf16>
    %cst_14 = arith.constant 0.000000e+00 : bf16
    %31 = vector.broadcast %cst_14 : bf16 to vector<1x8x128xbf16>
    %32 = vector.extract_strided_slice %30 {offsets = [0, 0, 0], sizes = [5, 8, 128], strides = [1, 1, 1]} : vector<6x8x128xbf16> to vector<5x8x128xbf16>
    %33 = tpu.concatenate %31, %32 in 0 : vector<1x8x128xbf16>, vector<5x8x128xbf16> -> vector<6x8x128xbf16>
    %34 = vector.extract_strided_slice %30 {offsets = [1, 0, 0], sizes = [5, 8, 128], strides = [1, 1, 1]} : vector<6x8x128xbf16> to vector<5x8x128xbf16>
    %35 = tpu.concatenate %34, %31 in 0 : vector<5x8x128xbf16>, vector<1x8x128xbf16> -> vector<6x8x128xbf16>
    %36 = tpu.concatenate %33, %30, %35 in 2 : vector<6x8x128xbf16>, vector<6x8x128xbf16>, vector<6x8x128xbf16> -> vector<6x8x384xbf16>
    %37 = vector.shape_cast %36 : vector<6x8x384xbf16> to vector<48x384xbf16>
    %cst_15 = arith.constant dense<0.000000e+00> : vector<48x128xf32>
    %38 = tpu.matmul %37, %2, %cst_15 {dimension_numbers = #tpu.dot_dimension_numbers<[1], [0], [0], [1], [0, 0, 1, 1], [], []>} : vector<48x384xbf16>, vector<384x128xbf16>, vector<48x128xf32> -> vector<48x128xf32>
    %39 = vector.broadcast %3 : vector<1x128xf32> to vector<48x128xf32>
    %40 = arith.addf %38, %39 : vector<48x128xf32>
    %41 = vector.shape_cast %40 : vector<48x128xf32> to vector<6x8x128xf32>
    %cst_16 = arith.constant 0.000000e+00 : f32
    %42 = vector.broadcast %cst_16 : f32 to vector<1x8x128xf32>
    %43 = tpu.concatenate %41, %42 in 0 : vector<6x8x128xf32>, vector<1x8x128xf32> -> vector<7x8x128xf32>
    %44 = vector.extract_strided_slice %43 {offsets = [0, 0, 0], sizes = [5, 8, 128], strides = [1, 1, 1]} : vector<7x8x128xf32> to vector<5x8x128xf32>
    %45 = vector.extract_strided_slice %43 {offsets = [1, 0, 0], sizes = [5, 8, 128], strides = [1, 1, 1]} : vector<7x8x128xf32> to vector<5x8x128xf32>
    %46 = arith.maximumf %44, %45 : vector<5x8x128xf32>
    %47 = vector.extract_strided_slice %43 {offsets = [2, 0, 0], sizes = [5, 8, 128], strides = [1, 1, 1]} : vector<7x8x128xf32> to vector<5x8x128xf32>
    %48 = arith.maximumf %46, %47 : vector<5x8x128xf32>
    %49 = tpu.concatenate %48, %42 in 0 : vector<5x8x128xf32>, vector<1x8x128xf32> -> vector<6x8x128xf32>
    %50 = vector.shape_cast %49 : vector<6x8x128xf32> to vector<3x2x8x128xf32>
    %51 = vector.extract_strided_slice %50 {offsets = [0, 0, 0, 0], sizes = [3, 1, 8, 128], strides = [1, 1, 1, 1]} : vector<3x2x8x128xf32> to vector<3x1x8x128xf32>
    %52 = vector.shape_cast %51 : vector<3x1x8x128xf32> to vector<3x8x128xf32>
    %cst_17 = arith.constant 0.000000e+00 : f32
    %53 = vector.broadcast %cst_17 : f32 to vector<3x8x128xf32>
    %54 = arith.maximumf %52, %53 : vector<3x8x128xf32>
    %55 = arith.truncf %54 : vector<3x8x128xf32> to vector<3x8x128xbf16>
    %cst_18 = arith.constant 0.000000e+00 : bf16
    %56 = vector.broadcast %cst_18 : bf16 to vector<1x8x128xbf16>
    %57 = vector.extract_strided_slice %55 {offsets = [0, 0, 0], sizes = [2, 8, 128], strides = [1, 1, 1]} : vector<3x8x128xbf16> to vector<2x8x128xbf16>
    %58 = tpu.concatenate %56, %57 in 0 : vector<1x8x128xbf16>, vector<2x8x128xbf16> -> vector<3x8x128xbf16>
    %59 = vector.extract_strided_slice %55 {offsets = [1, 0, 0], sizes = [2, 8, 128], strides = [1, 1, 1]} : vector<3x8x128xbf16> to vector<2x8x128xbf16>
    %60 = tpu.concatenate %59, %56 in 0 : vector<2x8x128xbf16>, vector<1x8x128xbf16> -> vector<3x8x128xbf16>
    %61 = tpu.concatenate %58, %55, %60 in 2 : vector<3x8x128xbf16>, vector<3x8x128xbf16>, vector<3x8x128xbf16> -> vector<3x8x384xbf16>
    %62 = vector.shape_cast %61 : vector<3x8x384xbf16> to vector<24x384xbf16>
    %cst_19 = arith.constant dense<0.000000e+00> : vector<24x128xf32>
    %63 = tpu.matmul %62, %2, %cst_19 {dimension_numbers = #tpu.dot_dimension_numbers<[1], [0], [0], [1], [0, 0, 1, 1], [], []>} : vector<24x384xbf16>, vector<384x128xbf16>, vector<24x128xf32> -> vector<24x128xf32>
    %64 = vector.broadcast %3 : vector<1x128xf32> to vector<24x128xf32>
    %65 = arith.addf %63, %64 : vector<24x128xf32>
    %66 = vector.shape_cast %65 : vector<24x128xf32> to vector<3x8x128xf32>
    %cst_20 = arith.constant 0.000000e+00 : f32
    %67 = vector.broadcast %cst_20 : f32 to vector<3x8x128xf32>
    %68 = arith.maximumf %66, %67 : vector<3x8x128xf32>
    %69 = arith.truncf %68 : vector<3x8x128xf32> to vector<3x8x128xbf16>
    %cst_21 = arith.constant 0.000000e+00 : bf16
    %70 = vector.broadcast %cst_21 : bf16 to vector<1x8x128xbf16>
    %71 = vector.extract_strided_slice %69 {offsets = [0, 0, 0], sizes = [2, 8, 128], strides = [1, 1, 1]} : vector<3x8x128xbf16> to vector<2x8x128xbf16>
    %72 = tpu.concatenate %70, %71 in 0 : vector<1x8x128xbf16>, vector<2x8x128xbf16> -> vector<3x8x128xbf16>
    %73 = vector.extract_strided_slice %69 {offsets = [1, 0, 0], sizes = [2, 8, 128], strides = [1, 1, 1]} : vector<3x8x128xbf16> to vector<2x8x128xbf16>
    %74 = tpu.concatenate %73, %70 in 0 : vector<2x8x128xbf16>, vector<1x8x128xbf16> -> vector<3x8x128xbf16>
    %75 = tpu.concatenate %72, %69, %74 in 2 : vector<3x8x128xbf16>, vector<3x8x128xbf16>, vector<3x8x128xbf16> -> vector<3x8x384xbf16>
    %76 = vector.shape_cast %75 : vector<3x8x384xbf16> to vector<24x384xbf16>
    %cst_22 = arith.constant dense<0.000000e+00> : vector<24x128xf32>
    %77 = tpu.matmul %76, %2, %cst_22 {dimension_numbers = #tpu.dot_dimension_numbers<[1], [0], [0], [1], [0, 0, 1, 1], [], []>} : vector<24x384xbf16>, vector<384x128xbf16>, vector<24x128xf32> -> vector<24x128xf32>
    %78 = vector.broadcast %3 : vector<1x128xf32> to vector<24x128xf32>
    %79 = arith.addf %77, %78 : vector<24x128xf32>
    %80 = vector.shape_cast %79 : vector<24x128xf32> to vector<3x8x128xf32>
    %81 = arith.addf %80, %52 : vector<3x8x128xf32>
    %cst_23 = arith.constant 0.000000e+00 : f32
    %82 = vector.broadcast %cst_23 : f32 to vector<1x8x128xf32>
    %83 = tpu.concatenate %81, %82 in 0 : vector<3x8x128xf32>, vector<1x8x128xf32> -> vector<4x8x128xf32>
    %84 = vector.extract_strided_slice %83 {offsets = [0, 0, 0], sizes = [2, 8, 128], strides = [1, 1, 1]} : vector<4x8x128xf32> to vector<2x8x128xf32>
    %85 = vector.extract_strided_slice %83 {offsets = [1, 0, 0], sizes = [2, 8, 128], strides = [1, 1, 1]} : vector<4x8x128xf32> to vector<2x8x128xf32>
    %86 = arith.maximumf %84, %85 : vector<2x8x128xf32>
    %87 = vector.extract_strided_slice %83 {offsets = [2, 0, 0], sizes = [2, 8, 128], strides = [1, 1, 1]} : vector<4x8x128xf32> to vector<2x8x128xf32>
    %88 = arith.maximumf %86, %87 : vector<2x8x128xf32>
    %89 = vector.shape_cast %88 : vector<2x8x128xf32> to vector<1x2x8x128xf32>
    %90 = vector.extract_strided_slice %89 {offsets = [0, 0, 0, 0], sizes = [1, 1, 8, 128], strides = [1, 1, 1, 1]} : vector<1x2x8x128xf32> to vector<1x1x8x128xf32>
    %91 = vector.shape_cast %90 : vector<1x1x8x128xf32> to vector<1x8x128xf32>
    %cst_24 = arith.constant 0.000000e+00 : f32
    %92 = vector.broadcast %cst_24 : f32 to vector<1x8x128xf32>
    %93 = arith.maximumf %91, %92 : vector<1x8x128xf32>
    %94 = arith.truncf %93 : vector<1x8x128xf32> to vector<1x8x128xbf16>
    %cst_25 = arith.constant 0.000000e+00 : bf16
    %95 = vector.broadcast %cst_25 : bf16 to vector<1x8x128xbf16>
    %96 = tpu.concatenate %95, %94, %95 in 2 : vector<1x8x128xbf16>, vector<1x8x128xbf16>, vector<1x8x128xbf16> -> vector<1x8x384xbf16>
    %97 = vector.shape_cast %96 : vector<1x8x384xbf16> to vector<8x384xbf16>
    %cst_26 = arith.constant dense<0.000000e+00> : vector<8x128xf32>
    %98 = tpu.matmul %97, %2, %cst_26 {dimension_numbers = #tpu.dot_dimension_numbers<[1], [0], [0], [1], [0, 0, 1, 1], [], []>} : vector<8x384xbf16>, vector<384x128xbf16>, vector<8x128xf32> -> vector<8x128xf32>
    %99 = vector.broadcast %3 : vector<1x128xf32> to vector<8x128xf32>
    %100 = arith.addf %98, %99 : vector<8x128xf32>
    %101 = vector.shape_cast %100 : vector<8x128xf32> to vector<1x8x128xf32>
    %cst_27 = arith.constant 0.000000e+00 : f32
    %102 = vector.broadcast %cst_27 : f32 to vector<1x8x128xf32>
    %103 = arith.maximumf %101, %102 : vector<1x8x128xf32>
    %104 = arith.truncf %103 : vector<1x8x128xf32> to vector<1x8x128xbf16>
    %cst_28 = arith.constant 0.000000e+00 : bf16
    %105 = vector.broadcast %cst_28 : bf16 to vector<1x8x128xbf16>
    %106 = tpu.concatenate %105, %104, %105 in 2 : vector<1x8x128xbf16>, vector<1x8x128xbf16>, vector<1x8x128xbf16> -> vector<1x8x384xbf16>
    %107 = vector.shape_cast %106 : vector<1x8x384xbf16> to vector<8x384xbf16>
    %cst_29 = arith.constant dense<0.000000e+00> : vector<8x128xf32>
    %108 = tpu.matmul %107, %2, %cst_29 {dimension_numbers = #tpu.dot_dimension_numbers<[1], [0], [0], [1], [0, 0, 1, 1], [], []>} : vector<8x384xbf16>, vector<384x128xbf16>, vector<8x128xf32> -> vector<8x128xf32>
    %109 = vector.broadcast %3 : vector<1x128xf32> to vector<8x128xf32>
    %110 = arith.addf %108, %109 : vector<8x128xf32>
    %111 = vector.shape_cast %110 : vector<8x128xf32> to vector<1x8x128xf32>
    %112 = arith.addf %111, %91 : vector<1x8x128xf32>
    %113 = vector.shape_cast %112 : vector<1x8x128xf32> to vector<8x128xf32>
    %114 = arith.truncf %113 : vector<8x128xf32> to vector<8x128xbf16>
    %c0_30 = arith.constant 0 : index
    %c0_31 = arith.constant 0 : index
    %115 = vector.load %arg6[%c0_30, %c0_31] : memref<128x128xbf16, #tpu.memory_space<vmem>>, vector<128x128xbf16>
    %cst_32 = arith.constant dense<0.000000e+00> : vector<8x128xf32>
    %116 = tpu.matmul %114, %115, %cst_32 {dimension_numbers = #tpu.dot_dimension_numbers<[1], [0], [0], [1], [0, 0, 1, 1], [], []>} : vector<8x128xbf16>, vector<128x128xbf16>, vector<8x128xf32> -> vector<8x128xf32>
    %c0_33 = arith.constant 0 : index
    %c0_34 = arith.constant 0 : index
    %117 = vector.load %arg7[%c0_33, %c0_34] : memref<1x128xf32, #tpu.memory_space<vmem>>, vector<1x128xf32>
    %118 = vector.broadcast %117 : vector<1x128xf32> to vector<8x128xf32>
    %119 = arith.addf %116, %118 : vector<8x128xf32>
    %c0_35 = arith.constant 0 : index
    %c0_36 = arith.constant 0 : index
    %120 = vector.load %arg8[%c0_35, %c0_36] : memref<8x128xf32, #tpu.memory_space<vmem>>, vector<8x128xf32>
    tpu.vector_store %arg8[%c0_35, %c0_36], %119 {strides = array<i32>} : memref<8x128xf32, #tpu.memory_space<vmem>>, vector<8x128xf32>,
    return
  }
  func.func @transform_0(%arg0: i32) -> (i32, i32, i32) {
    %c0_i32 = arith.constant 0 : i32
    %c0_i32_0 = arith.constant 0 : i32
    %c0_i32_1 = arith.constant 0 : i32
    return %c0_i32, %arg0, %c0_i32_0 : i32, i32, i32
  }
  func.func @transform_1(%arg0: i32) -> (i32, i32) {
    %c0_i32 = arith.constant 0 : i32
    %c0_i32_0 = arith.constant 0 : i32
    %c0_i32_1 = arith.constant 0 : i32
    return %c0_i32, %c0_i32_0 : i32, i32
  }
  func.func @transform_2(%arg0: i32) -> (i32, i32) {
    %c0_i32 = arith.constant 0 : i32
    %c0_i32_0 = arith.constant 0 : i32
    %c0_i32_1 = arith.constant 0 : i32
    return %c0_i32, %c0_i32_0 : i32, i32
  }
  func.func @transform_3(%arg0: i32) -> (i32, i32) {
    %c0_i32 = arith.constant 0 : i32
    %c0_i32_0 = arith.constant 0 : i32
    %c0_i32_1 = arith.constant 0 : i32
    return %c0_i32, %c0_i32_0 : i32, i32
  }
  func.func @transform_4(%arg0: i32) -> (i32, i32) {
    %c0_i32 = arith.constant 0 : i32
    %c0_i32_0 = arith.constant 0 : i32
    %c0_i32_1 = arith.constant 0 : i32
    return %c0_i32, %c0_i32_0 : i32, i32
  }
  func.func @transform_5(%arg0: i32) -> (i32, i32) {
    %c0_i32 = arith.constant 0 : i32
    %c0_i32_0 = arith.constant 0 : i32
    %c0_i32_1 = arith.constant 0 : i32
    return %c0_i32, %c0_i32_0 : i32, i32
  }
  func.func @transform_6(%arg0: i32) -> (i32, i32) {
    %c0_i32 = arith.constant 0 : i32
    %c0_i32_0 = arith.constant 0 : i32
    %c0_i32_1 = arith.constant 0 : i32
    return %c0_i32, %c0_i32_0 : i32, i32
  }
  func.func @transform_7(%arg0: i32) -> (i32, i32) {
    %c0_i32 = arith.constant 0 : i32
    %c0_i32_0 = arith.constant 0 : i32
    return %arg0, %c0_i32 : i32, i32
  }
}

</mosaic_0001>

<bundles_post_ra>
// kernel: dpcnn_forward.1
= control target key start
LH: loop header
LB: loop body
LE: loop exit
PB: predicated region body
PF: predicated region fallthrough
CT: control target
= control target key end

     0   :  { %v2059_v1 = vmov 0.0   ;;  %vm2060_vm0 = vmmov 0   ;;  %s2648_s1 = inlined_call_operand.vmem [shape: bf16[384,128], index: 1, kind: input, shape index: {}]   ;;  %s2649_s0 = inlined_call_operand.vmem [shape: bf16[8,8,128], index: 0, kind: input, shape index: {}]   ;;  %s2650_s3 = inlined_call_operand.vmem [shape: bf16[384,128], index: 3, kind: input, shape index: {}]   ;;  %s2651_s2 = inlined_call_operand.vmem [shape: f32[1,128], index: 2, kind: input, shape index: {}]   ;;  %s2652_s4 = inlined_call_operand.vmem [shape: f32[1,128], index: 4, kind: input, shape index: {}]   ;;  %s2653_s5 = inlined_call_operand.vmem [shape: bf16[128,128], index: 5, kind: input, shape index: {}]   ;;  %s2654_s6 = inlined_call_operand.vmem [shape: f32[1,128], index: 6, kind: input, shape index: {}]   ;;  %s2655_s7 = inlined_call_operand.vmem [shape: f32[8,128], index: 7, kind: output, shape index: {}]  }
   0x1   :  { %v1992_v0 = vld [vmem:[%s2648_s1 + $0x40] sm:$0xff]   ;;  %1805 = vmatprep.subr.bf16.mxu1 %v2059_v1  ;;  %1821 = vmatprep.mubr.msk.bf16.mxu1 %vm2060_vm0, %v2059_v1  ;;  %v1995_v4 = vld [vmem:[%s2648_s1 + $0x48] sm:$0xff]   ;;  %v1998_v7 = vld [vmem:[%s2648_s1 + $0x50] sm:$0xff]  }
   0x2   :  { %v1993_v2 = vld [vmem:[%s2648_s1] sm:$0xff]   ;;  %1523 = vmatprep.subr.bf16.mxu0 %v1992_v0  ;;  %v1996_v5 = vld [vmem:[%s2648_s1 + $0x8] sm:$0xff]   ;;  %v1999_v8 = vld [vmem:[%s2648_s1 + $0x10] sm:$0xff]  }
   0x3   :  { %v1994_v3 = vld [vmem:[%s2648_s1 + $0x80] sm:$0xff]   ;;  %1524 = vmatpush3.bf16.msra.mxu0 %v1993_v2  ;;  %v1997_v6 = vld [vmem:[%s2648_s1 + $0x88] sm:$0xff]   ;;  %v2000_v9 = vld [vmem:[%s2648_s1 + $0x90] sm:$0xff]  }
   0x4   :  { %1806 = vmatpush3.bf16.msra.mxu1 %v1994_v3  ;;  %1525 = vmatprep.subr.bf16.mxu0 %v1995_v4  ;;  %v2001_v10 = vld [vmem:[%s2648_s1 + $0x58] sm:$0xff]   ;;  %v2004_v13 = vld [vmem:[%s2648_s1 + $0x60] sm:$0xff]   ;;  %v2007_v16 = vld [vmem:[%s2648_s1 + $0x68] sm:$0xff]  }
   0x5   :  { %1807 = vmatprep.subr.bf16.mxu1 %v2059_v1  ;;  %v2002_v11 = vld [vmem:[%s2648_s1 + $0x18] sm:$0xff]   ;;  %v2005_v14 = vld [vmem:[%s2648_s1 + $0x20] sm:$0xff]   ;;  %v2008_v17 = vld [vmem:[%s2648_s1 + $0x28] sm:$0xff]  }
   0x6   :  { %v2003_v12 = vld [vmem:[%s2648_s1 + $0x98] sm:$0xff]   ;;  %v2006_v15 = vld [vmem:[%s2648_s1 + $0xa0] sm:$0xff]   ;;  %v2009_v18 = vld [vmem:[%s2648_s1 + $0xa8] sm:$0xff]  }
   0x7   :  { %1526 = vmatpush3.bf16.msra.mxu0 %v1996_v5  ;;  %v2010_v19 = vld [vmem:[%s2648_s1 + $0x70] sm:$0xff]   ;;  %v126_v22 = vld [vmem:[%s2649_s0 + $0x4] sm:$0xf]  ;;  %v127_v23 = vld [vmem:[%s2649_s0 + $0x8] sm:$0xf] }
   0x8   :  { %1808 = vmatpush3.bf16.msra.mxu1 %v1997_v6  ;;  %1527 = vmatprep.subr.bf16.mxu0 %v1998_v7  ;;  %v2011_v20 = vld [vmem:[%s2648_s1 + $0x30] sm:$0xff]   ;;  %v2013_v24 = vld [vmem:[%s2648_s1 + $0x78] sm:$0xff]   ;;  %v1416_v25 = vcombine.low %v126_v22, %v127_v23  ;;  %v125_v27 = vld [vmem:[%s2649_s0] sm:$0xf] }
   0x9   :  { %1809 = vmatprep.subr.bf16.mxu1 %v2059_v1  ;;  %v2012_v21 = vld [vmem:[%s2648_s1 + $0xb0] sm:$0xff]   ;;  %v2014_v26 = vld [vmem:[%s2648_s1 + $0x38] sm:$0xff]   ;;  %v128_v28 = vld [vmem:[%s2649_s0 + $0xc] sm:$0xf]  ;;  %v1415_v32 = vcombine.low %v125_v27, %v126_v22  ;;  %v2061_v27 = vmov 0  }
   0xa   :  { %345 = vmatprep.mubr.bf16.mxu0 %v1416_v25  ;;  %v2018_v29 = vld [vmem:[%s2648_s1 + $0xb8] sm:$0xff]   ;;  %v129_v30 = vld [vmem:[%s2649_s0 + $0x10] sm:$0xf]  ;;  %v2201_v31 = vld [vmem:[%s2650_s3 + $0x40] sm:$0xff]   ;;  %v1417_v33 = vcombine.low %v127_v23, %v128_v28 }
   0xb   :  { %1528 = vmatpush3.bf16.msra.mxu0 %v1999_v8  ;;  %v1418_v34 = vcombine.low %v128_v28, %v129_v30  ;;  %v2207_v35 = vld [vmem:[%s2650_s3] sm:$0xff]   ;;  %v2213_v36 = vld [vmem:[%s2650_s3 + $0x48] sm:$0xff]   ;;  %v130_v38 = vld [vmem:[%s2649_s0 + $0x14] sm:$0xf] }
   0xc   :  { %1810 = vmatpush3.bf16.msra.mxu1 %v2000_v9  ;;  %1529 = vmatprep.subr.bf16.mxu0 %v2001_v10  ;;  %v2219_v37 = vld [vmem:[%s2650_s3 + $0x80] sm:$0xff]   ;;  %v131_v39 = vld [vmem:[%s2649_s0 + $0x18] sm:$0xf]  ;;  %v2230_v40 = vld [vmem:[%s2650_s3 + $0x8] sm:$0xff]   ;;  %v1419_v44 = vcombine.low %v129_v30, %v130_v38 }
   0xd   :  { %1811 = vmatprep.subr.bf16.mxu1 %v2059_v1  ;;  %v2238_v41 = vld [vmem:[%s2650_s3 + $0x50] sm:$0xff]   ;;  %v2245_v42 = vld [vmem:[%s2650_s3 + $0x88] sm:$0xff]   ;;  %v1420_v45 = vcombine.low %v130_v38, %v131_v39  ;;  %v2256_v46 = vld [vmem:[%s2650_s3 + $0x58] sm:$0xff]  }
   0xe   :  { %v2250_v43 = vld [vmem:[%s2650_s3 + $0x10] sm:$0xff]   ;;  %v132_v48 = vld [vmem:[%s2649_s0 + $0x1c] sm:$0xf]  ;;  %v2278_v50 = vld [vmem:[%s2650_s3 + $0x60] sm:$0xff]  }
   0xf   :  { %1530 = vmatpush3.bf16.msra.mxu0 %v2002_v11  ;;  %v2261_v47 = vld [vmem:[%s2650_s3 + $0x90] sm:$0xff]   ;;  %v2272_v49 = vld [vmem:[%s2650_s3 + $0x18] sm:$0xff]   ;;  %v1421_v51 = vcombine.low %v131_v39, %v132_v48  ;;  %v2293_v52 = vld [vmem:[%s2650_s3 + $0x20] sm:$0xff]  }
  0x10   :  { %1812 = vmatpush3.bf16.msra.mxu1 %v2003_v12  ;;  %1531 = vmatprep.subr.bf16.mxu0 %v2004_v13  ;;  %v2298_v53 = vld [vmem:[%s2650_s3 + $0x98] sm:$0xff]   ;;  %v2305_v54 = vld [vmem:[%s2650_s3 + $0x68] sm:$0xff]   ;;  %v2317_v56 = vld [vmem:[%s2650_s3 + $0xa0] sm:$0xff]  }
  0x11   :  { %1813 = vmatprep.subr.bf16.mxu1 %v2059_v1  ;;  %v2310_v55 = vld [vmem:[%s2650_s3 + $0x28] sm:$0xff]   ;;  %v2324_v57 = vld [vmem:[%s2650_s3 + $0x70] sm:$0xff]   ;;  %v2343_v60 = vld [vmem:[%s2650_s3 + $0x78] sm:$0xff]  }
  0x12   :  { %v2329_v58 = vld [vmem:[%s2650_s3 + $0x30] sm:$0xff]   ;;  %v2336_v59 = vld [vmem:[%s2650_s3 + $0xa8] sm:$0xff]   ;;  %v2348_v61 = vld [vmem:[%s2650_s3 + $0x38] sm:$0xff]  }
  0x13   :  { %1532 = vmatpush3.bf16.msra.mxu0 %v2005_v14  ;;  %v2355_v62 = vld [vmem:[%s2650_s3 + $0xb0] sm:$0xff]   ;;  %v2364_v63 = vld [vmem:[%s2650_s3 + $0xb8] sm:$0xff]   ;;  %v1414_v3 = vld [vmem:[%s2651_s2] ss:$0 sm:$0xff] }
  0x14   :  { %1814 = vmatpush3.bf16.msra.mxu1 %v2006_v15  ;;  %1533 = vmatprep.subr.bf16.mxu0 %v2007_v16 }
  0x15   :  { %1815 = vmatprep.subr.bf16.mxu1 %v2059_v1 }
  0x17   :  { %1534 = vmatpush3.bf16.msra.mxu0 %v2008_v17 }
  0x18   :  { %1816 = vmatpush3.bf16.msra.mxu1 %v2009_v18  ;;  %1535 = vmatprep.subr.bf16.mxu0 %v2010_v19 }
  0x19   :  { %1817 = vmatprep.subr.bf16.mxu1 %v2059_v1 }
  0x1b   :  { %1536 = vmatpush3.bf16.msra.mxu0 %v2011_v20 }
  0x1c   :  { %1818 = vmatpush3.bf16.msra.mxu1 %v2012_v21  ;;  %1537 = vmatprep.subr.bf16.mxu0 %v2013_v24 }
  0x1d   :  { %1819 = vmatprep.subr.bf16.mxu1 %v2059_v1 }
  0x1f   :  { %1538 = vmatpush3.bf16.msra.mxu0 %v2014_v26 }
  0x20   :  { %1820 = vmatpush3.bf16.msra.mxu1 %v2018_v29  ;;  %1568 = vmatprep.subr.bf16.mxu0 %v2201_v31 }
  0x21   :  { %1833 = vmatprep.subr.bf16.mxu1 %v2059_v1 }
  0x22   :  { %346 = vmatmul.mubr.bf16.vlgmr.msra.gmra.mrb[0].mxu0 %v1415_v32 }
  0x23   :  { %1822 = vmatmul.mubr.bf16.vlgmr.msra.gmra.mrb[0].mxu1 %v1417_v33  ;;  %353 = vmatprep.mubr.bf16.mxu0 %v1418_v34 }
  0x24   :  { %1825 = vmatprep.mubr.msk.bf16.mxu1 %vm2060_vm0, %v2059_v1  ;;  %1569 = vmatpush3.bf16.msra.mxu0 %v2207_v35 }
  0x25   :  { %1570 = vmatprep.subr.bf16.mxu0 %v2213_v36  ;;  %1834 = vmatpush3.bf16.msra.mxu1 %v2219_v37 }
  0x26   :  { %1835 = vmatprep.subr.bf16.mxu1 %v2059_v1 }
  0x28   :  { %1571 = vmatpush3.bf16.msra.mxu0 %v2230_v40 }
  0x29   :  { %1572 = vmatprep.subr.bf16.mxu0 %v2238_v41  ;;  %1836 = vmatpush3.bf16.msra.mxu1 %v2245_v42 }
  0x2a   :  { %354 = vmatmul.mubr.bf16.gmra.mrb[4].mxu0 %v1417_v33  ;;  %1837 = vmatprep.subr.bf16.mxu1 %v2059_v1 }
  0x2b   :  { %1826 = vmatmul.mubr.bf16.gmra.mrb[4].mxu1 %v1419_v44  ;;  %361 = vmatprep.mubr.bf16.mxu0 %v1420_v45 }
  0x2c   :  { %1829 = vmatprep.mubr.msk.bf16.mxu1 %vm2060_vm0, %v2059_v1  ;;  %1573 = vmatpush3.bf16.msra.mxu0 %v2250_v43 }
  0x2d   :  { %1574 = vmatprep.subr.bf16.mxu0 %v2256_v46  ;;  %1838 = vmatpush3.bf16.msra.mxu1 %v2261_v47 }
  0x2e   :  { %1839 = vmatprep.subr.bf16.mxu1 %v2059_v1 }
  0x30   :  { %1575 = vmatpush3.bf16.msra.mxu0 %v2272_v49 }
  0x31   :  { %1576 = vmatprep.subr.bf16.mxu0 %v2278_v50  ;;  %1840 = vmatpush3.bf16.msra.mxu1 %v2298_v53 }
  0x32   :  { %362 = vmatmul.mubr.bf16.gmra.mrb[8].mxu0 %v1419_v44  ;;  %1841 = vmatprep.subr.bf16.mxu1 %v2059_v1 }
  0x33   :  { %1830 = vmatmul.mubr.bf16.gmra.mrb[8].mxu1 %v1421_v51 }
  0x34   :  { %1849 = vmatprep.mubr.msk.bf16.mxu1 %vm2060_vm0, %v2059_v1  ;;  %1577 = vmatpush3.bf16.msra.mxu0 %v2293_v52 }
  0x35   :  { %1578 = vmatprep.subr.bf16.mxu0 %v2305_v54  ;;  %1842 = vmatpush3.bf16.msra.mxu1 %v2317_v56 }
  0x36   :  { %1843 = vmatprep.subr.bf16.mxu1 %v2059_v1 }
  0x38   :  { %1579 = vmatpush3.bf16.msra.mxu0 %v2310_v55 }
  0x39   :  { %1580 = vmatprep.subr.bf16.mxu0 %v2324_v57  ;;  %1844 = vmatpush3.bf16.msra.mxu1 %v2336_v59 }
  0x3a   :  { %1845 = vmatprep.subr.bf16.mxu1 %v2059_v1 }
  0x3c   :  { %1581 = vmatpush3.bf16.msra.mxu0 %v2329_v58 }
  0x3d   :  { %1582 = vmatprep.subr.bf16.mxu0 %v2343_v60  ;;  %1846 = vmatpush3.bf16.msra.mxu1 %v2355_v62 }
  0x3e   :  { %1847 = vmatprep.subr.bf16.mxu1 %v2059_v1 }
  0x40   :  { %1583 = vmatpush3.bf16.msra.mxu0 %v2348_v61 }
  0x41   :  { %1613 = vmatprep.subr.bf16.mxu0 %v2201_v31  ;;  %1848 = vmatpush3.bf16.msra.mxu1 %v2364_v63 }
  0x42   :  { %1861 = vmatprep.subr.bf16.mxu1 %v2059_v1 }
  0xf5   :  { %v1539_v0 = vpop.f32.mrb[0].mxu0 }
  0xf6   :  { %v1540_v2 = vpop.f32.mrb[1].mxu0  ;;  %v404_v4 = vpop.f32.mrb[0].mxu1 }
  0xf7   :  { %v1541_v5 = vadd.f32 %v1540_v2, %v1539_v0  ;;  %v1542_v6 = vpop.f32.mrb[2].mxu0  ;;  %v1823_v7 = vpop.f32.mrb[1].mxu1 }
  0xf8   :  { %v1543_v8 = vpop.f32.mrb[3].mxu0  ;;  %v407_v9 = vpop.f32.mrb[2].mxu1 }
  0xf9   :  { %v348_v10 = vadd.f32 %v1541_v5, %v1414_v3  ;;  %v1544_v11 = vadd.f32 %v1543_v8, %v1542_v6  ;;  %v1824_v12 = vpop.f32.mrb[3].mxu1 }
  0xfb   :  { %v405_v13 = vadd.f32 %v404_v4, %v348_v10  ;;  %v351_v14 = vadd.f32 %v1544_v11, %v1414_v3 }
  0xfd   :  { %v427_v15 = vmax.f32 %v405_v13, 0.0  ;;  %v408_v16 = vadd.f32 %v407_v9, %v351_v14  ;;  %v1545_v17 = vpop.f32.mrb[4].mxu0 }
  0xfe   :  { %v1546_v18 = vpop.f32.mrb[5].mxu0  ;;  %v412_v19 = vpop.f32.mrb[4].mxu1 }
  0xff   :  { %v433_v20 = vpack.c.bf16 %v427_v15, %v427_v15  ;;  %v428_v21 = vmax.f32 %v408_v16, 0.0  ;;  %v1547_v22 = vadd.f32 %v1546_v18, %v1545_v17  ;;  %v1548_v23 = vpop.f32.mrb[6].mxu0  ;;  %v1827_v24 = vpop.f32.mrb[5].mxu1 }
 0x100   :  { %v1549_v25 = vpop.f32.mrb[7].mxu0  ;;  %v415_v26 = vpop.f32.mrb[6].mxu1 }
 0x101   :  { %v1447_v28 = vcombine.low %v2061_v27, %v433_v20  ;;  %v1505_v29 = vpack.c.bf16 %v428_v21, %v427_v15  ;;  %v356_v30 = vadd.f32 %v1547_v22, %v1414_v3  ;;  %v1550_v32 = vadd.f32 %v1549_v25, %v1548_v23  ;;  %v1828_v33 = vpop.f32.mrb[7].mxu1  ;;  %v2414_v23 = vld [vmem:[%s2652_s4] ss:$0 sm:$0xff] }
 0x103   :  { %v413_v34 = vadd.f32 %v412_v19, %v356_v30  ;;  %v359_v38 = vadd.f32 %v1550_v32, %v1414_v3  ;;  %649 = vmatprep.mubr.bf16.mxu0 %v1505_v29 }
 0x104   :  { %650 = vmatmul.mubr.bf16.vlgmr.msra.gmra.mrb[12].mxu0 %v1447_v28 }
 0x105   :  { %v429_v39 = vmax.f32 %v413_v34, 0.0  ;;  %v416_v44 = vadd.f32 %v415_v26, %v359_v38  ;;  %v1551_v45 = vpop.f32.mrb[8].mxu0  ;;  %1614 = vmatpush3.bf16.msra.mxu0 %v2207_v35 }
 0x106   :  { %v1552_v48 = vpop.f32.mrb[9].mxu0  ;;  %v420_v51 = vpop.f32.mrb[8].mxu1  ;;  %1615 = vmatprep.subr.bf16.mxu0 %v2213_v36 }
 0x107   :  { %v1506_v0 = vpack.c.bf16 %v429_v39, %v428_v21  ;;  %v430_v2 = vmax.f32 %v416_v44, 0.0  ;;  %v1553_v4 = vadd.f32 %v1552_v48, %v1551_v45  ;;  %v1554_v5 = vpop.f32.mrb[10].mxu0  ;;  %v1831_v6 = vpop.f32.mrb[9].mxu1 }
 0x108   :  { %v1555_v7 = vpop.f32.mrb[11].mxu0  ;;  %v423_v8 = vpop.f32.mrb[10].mxu1 }
 0x109   :  { %v1507_v9 = vpack.c.bf16 %v430_v2, %v429_v39  ;;  %v364_v10 = vadd.f32 %v1553_v4, %v1414_v3  ;;  %v1556_v11 = vadd.f32 %v1555_v7, %v1554_v5  ;;  %1850 = vmatmul.mubr.bf16.vlgmr.msra.gmra.mrb[12].mxu1 %v1506_v0  ;;  %v1832_v12 = vpop.f32.mrb[11].mxu1  ;;  %1616 = vmatpush3.bf16.msra.mxu0 %v2230_v40 }
 0x10a   :  { %1853 = vmatprep.mubr.msk.bf16.mxu1 %vm2060_vm0, %v2059_v1  ;;  %1862 = vmatpush3.bf16.msra.mxu1 %v2219_v37 }
 0x10b   :  { %v421_v13 = vadd.f32 %v420_v51, %v364_v10  ;;  %v367_v14 = vadd.f32 %v1556_v11, %v1414_v3  ;;  %657 = vmatprep.mubr.bf16.mxu0 %v1507_v9  ;;  %1617 = vmatprep.subr.bf16.mxu0 %v2238_v41 }
 0x10c   :  { %658 = vmatmul.mubr.bf16.gmra.mrb[16].mxu0 %v1506_v0  ;;  %1863 = vmatprep.subr.bf16.mxu1 %v2059_v1 }
 0x10d   :  { %v431_v15 = vmax.f32 %v421_v13, 0.0  ;;  %v424_v16 = vadd.f32 %v423_v8, %v367_v14  ;;  %1618 = vmatpush3.bf16.msra.mxu0 %v2250_v43 }
 0x10e   :  { %1864 = vmatpush3.bf16.msra.mxu1 %v2245_v42  ;;  %1619 = vmatprep.subr.bf16.mxu0 %v2256_v46 }
 0x10f   :  { %v1508_v17 = vpack.c.bf16 %v431_v15, %v430_v2  ;;  %v432_v18 = vmax.f32 %v424_v16, 0.0  ;;  %1865 = vmatprep.subr.bf16.mxu1 %v2059_v1 }
 0x111   :  { %v1509_v19 = vpack.c.bf16 %v432_v18, %v431_v15  ;;  %1854 = vmatmul.mubr.bf16.gmra.mrb[16].mxu1 %v1508_v17  ;;  %1620 = vmatpush3.bf16.msra.mxu0 %v2272_v49  ;;  %v438_v3 = vpack.c.bf16 %v432_v18, %v432_v18 }
 0x112   :  { %1857 = vmatprep.mubr.msk.bf16.mxu1 %vm2060_vm0, %v2059_v1  ;;  %1866 = vmatpush3.bf16.msra.mxu1 %v2261_v47 }
 0x113   :  { %665 = vmatprep.mubr.bf16.mxu0 %v1509_v19  ;;  %1621 = vmatprep.subr.bf16.mxu0 %v2278_v50  ;;  %v1453_v20 = vcombine.low %v438_v3, %v2061_v27 }
 0x114   :  { %666 = vmatmul.mubr.bf16.gmra.mrb[20].mxu0 %v1508_v17  ;;  %1867 = vmatprep.subr.bf16.mxu1 %v2059_v1 }
 0x115   :  { %1622 = vmatpush3.bf16.msra.mxu0 %v2293_v52 }
 0x116   :  { %1868 = vmatpush3.bf16.msra.mxu1 %v2298_v53  ;;  %1623 = vmatprep.subr.bf16.mxu0 %v2305_v54 }
 0x117   :  { %1869 = vmatprep.subr.bf16.mxu1 %v2059_v1 }
 0x119   :  { %1858 = vmatmul.mubr.bf16.gmra.mrb[20].mxu1 %v1453_v20  ;;  %1624 = vmatpush3.bf16.msra.mxu0 %v2310_v55 }
 0x11a   :  { %1870 = vmatpush3.bf16.msra.mxu1 %v2317_v56  ;;  %1625 = vmatprep.subr.bf16.mxu0 %v2324_v57 }
 0x11b   :  { %1871 = vmatprep.subr.bf16.mxu1 %v2059_v1  ;;  %1877 = vmatprep.mubr.msk.bf16.mxu1 %vm2060_vm0, %v2059_v1 }
 0x11d   :  { %1626 = vmatpush3.bf16.msra.mxu0 %v2329_v58 }
 0x11e   :  { %1872 = vmatpush3.bf16.msra.mxu1 %v2336_v59  ;;  %1627 = vmatprep.subr.bf16.mxu0 %v2343_v60 }
 0x11f   :  { %1873 = vmatprep.subr.bf16.mxu1 %v2059_v1 }
 0x121   :  { %1628 = vmatpush3.bf16.msra.mxu0 %v2348_v61 }
 0x122   :  { %1874 = vmatpush3.bf16.msra.mxu1 %v2355_v62  ;;  %1658 = vmatprep.subr.bf16.mxu0 %v2201_v31 }
 0x123   :  { %1875 = vmatprep.subr.bf16.mxu1 %v2059_v1 }
 0x126   :  { %1876 = vmatpush3.bf16.msra.mxu1 %v2364_v63 }
 0x127   :  { %1889 = vmatprep.subr.bf16.mxu1 %v2219_v37 }
 0x1d7   :  { %v1584_v21 = vpop.f32.mrb[12].mxu0 }
 0x1d8   :  { %v1585_v22 = vpop.f32.mrb[13].mxu0 }
 0x1d9   :  { %v1586_v24 = vadd.f32 %v1585_v22, %v1584_v21  ;;  %v1587_v25 = vpop.f32.mrb[14].mxu0 }
 0x1da   :  { %v1588_v26 = vpop.f32.mrb[15].mxu0 }
 0x1db   :  { %v1589_v28 = vadd.f32 %v1588_v26, %v1587_v25  ;;  %v652_v29 = vadd.f32 %v1586_v24, %v2414_v23 }
 0x1dc   :  { %v708_v30 = vpop.f32.mrb[12].mxu1 }
 0x1dd   :  { %v709_v32 = vadd.f32 %v708_v30, %v652_v29  ;;  %v1851_v33 = vpop.f32.mrb[13].mxu1  ;;  %v655_v34 = vadd.f32 %v1589_v28, %v2414_v23 }
 0x1de   :  { %v711_v38 = vpop.f32.mrb[14].mxu1 }
 0x1df   :  { %v731_v39 = vmax.f32 %v709_v32, 0.0  ;;  %v712_v44 = vadd.f32 %v711_v38, %v655_v34  ;;  %v1590_v45 = vpop.f32.mrb[16].mxu0  ;;  %v1852_v48 = vpop.f32.mrb[15].mxu1 }
 0x1e0   :  { %v1591_v51 = vpop.f32.mrb[17].mxu0 }
 0x1e1   :  { %v737_v0 = vpack.c.bf16 %v731_v39, %v731_v39  ;;  %v732_v2 = vmax.f32 %v712_v44, 0.0  ;;  %v1592_v4 = vadd.f32 %v1591_v51, %v1590_v45  ;;  %v1593_v5 = vpop.f32.mrb[18].mxu0 }
 0x1e2   :  { %v1594_v6 = vpop.f32.mrb[19].mxu0 }
 0x1e3   :  { %v1478_v7 = vcombine.low %v2061_v27, %v737_v0  ;;  %v1510_v8 = vpack.c.bf16 %v732_v2, %v731_v39  ;;  %v1595_v9 = vadd.f32 %v1594_v6, %v1593_v5  ;;  %v660_v10 = vadd.f32 %v1592_v4, %v2414_v23 }
 0x1e4   :  { %v716_v11 = vpop.f32.mrb[16].mxu1 }
 0x1e5   :  { %v717_v12 = vadd.f32 %v716_v11, %v660_v10  ;;  %v1855_v13 = vpop.f32.mrb[17].mxu1  ;;  %801 = vmatprep.mubr.bf16.mxu0 %v1510_v8  ;;  %v663_v14 = vadd.f32 %v1595_v9, %v2414_v23 }
 0x1e6   :  { %v719_v15 = vpop.f32.mrb[18].mxu1  ;;  %802 = vmatmul.mubr.bf16.vlgmr.msra.gmra.mrb[24].mxu0 %v1478_v7 }
 0x1e7   :  { %v733_v16 = vmax.f32 %v717_v12, 0.0  ;;  %v720_v17 = vadd.f32 %v719_v15, %v663_v14  ;;  %v1596_v18 = vpop.f32.mrb[20].mxu0  ;;  %v1856_v19 = vpop.f32.mrb[19].mxu1  ;;  %1659 = vmatpush3.bf16.msra.mxu0 %v2207_v35 }
 0x1e8   :  { %v1597_v3 = vpop.f32.mrb[21].mxu0  ;;  %1660 = vmatprep.subr.bf16.mxu0 %v2213_v36 }
 0x1e9   :  { %v1511_v20 = vpack.c.bf16 %v733_v16, %v732_v2  ;;  %v734_v21 = vmax.f32 %v720_v17, 0.0  ;;  %v1598_v22 = vadd.f32 %v1597_v3, %v1596_v18  ;;  %v1599_v24 = vpop.f32.mrb[22].mxu0 }
 0x1ea   :  { %v1600_v25 = vpop.f32.mrb[23].mxu0 }
 0x1eb   :  { %v1512_v26 = vpack.c.bf16 %v734_v21, %v733_v16  ;;  %v1601_v28 = vadd.f32 %v1600_v25, %v1599_v24  ;;  %1878 = vmatmul.mubr.bf16.vlgmr.msra.gmra.mrb[24].mxu1 %v1511_v20  ;;  %v668_v29 = vadd.f32 %v1598_v22, %v2414_v23  ;;  %1661 = vmatpush3.bf16.msra.mxu0 %v2230_v40 }
 0x1ec   :  { %v724_v30 = vpop.f32.mrb[20].mxu1  ;;  %1881 = vmatprep.mubr.msk.bf16.mxu1 %vm2060_vm0, %v2059_v1  ;;  %1890 = vmatpush3.bf16.msra.mxu1 %v2219_v37 }
 0x1ed   :  { %v725_v32 = vadd.f32 %v724_v30, %v668_v29  ;;  %v1859_v33 = vpop.f32.mrb[21].mxu1  ;;  %809 = vmatprep.mubr.bf16.mxu0 %v1512_v26  ;;  %v671_v34 = vadd.f32 %v1601_v28, %v2414_v23  ;;  %1662 = vmatprep.subr.bf16.mxu0 %v2238_v41 }
 0x1ee   :  { %v727_v38 = vpop.f32.mrb[22].mxu1  ;;  %810 = vmatmul.mubr.bf16.gmra.mrb[28].mxu0 %v1511_v20  ;;  %1891 = vmatprep.subr.bf16.mxu1 %v2245_v42 }
 0x1ef   :  { %v735_v39 = vmax.f32 %v725_v32, 0.0  ;;  %v728_v44 = vadd.f32 %v727_v38, %v671_v34  ;;  %v1860_v45 = vpop.f32.mrb[23].mxu1  ;;  %1663 = vmatpush3.bf16.msra.mxu0 %v2250_v43 }
 0x1f0   :  { %1892 = vmatpush3.bf16.msra.mxu1 %v2245_v42  ;;  %1664 = vmatprep.subr.bf16.mxu0 %v2256_v46 }
 0x1f1   :  { %v1513_v48 = vpack.c.bf16 %v735_v39, %v734_v21  ;;  %v736_v51 = vmax.f32 %v728_v44, 0.0  ;;  %1893 = vmatprep.subr.bf16.mxu1 %v2261_v47 }
 0x1f3   :  { %v1514_v0 = vpack.c.bf16 %v736_v51, %v735_v39  ;;  %1882 = vmatmul.mubr.bf16.gmra.mrb[28].mxu1 %v1513_v48  ;;  %1665 = vmatpush3.bf16.msra.mxu0 %v2272_v49  ;;  %v742_v2 = vpack.c.bf16 %v736_v51, %v736_v51 }
 0x1f4   :  { %1885 = vmatprep.mubr.msk.bf16.mxu1 %vm2060_vm0, %v2059_v1  ;;  %1894 = vmatpush3.bf16.msra.mxu1 %v2261_v47 }
 0x1f5   :  { %817 = vmatprep.mubr.bf16.mxu0 %v1514_v0  ;;  %1666 = vmatprep.subr.bf16.mxu0 %v2278_v50  ;;  %v1484_v4 = vcombine.low %v742_v2, %v2061_v27 }
 0x1f6   :  { %818 = vmatmul.mubr.bf16.gmra.mrb[32].mxu0 %v1513_v48  ;;  %1895 = vmatprep.subr.bf16.mxu1 %v2298_v53 }
 0x1f7   :  { %1667 = vmatpush3.bf16.msra.mxu0 %v2293_v52 }
 0x1f8   :  { %1896 = vmatpush3.bf16.msra.mxu1 %v2298_v53  ;;  %1668 = vmatprep.subr.bf16.mxu0 %v2305_v54 }
 0x1f9   :  { %1897 = vmatprep.subr.bf16.mxu1 %v2317_v56 }
 0x1fb   :  { %1886 = vmatmul.mubr.bf16.gmra.mrb[32].mxu1 %v1484_v4  ;;  %1669 = vmatpush3.bf16.msra.mxu0 %v2310_v55 }
 0x1fc   :  { %1898 = vmatpush3.bf16.msra.mxu1 %v2317_v56  ;;  %1670 = vmatprep.subr.bf16.mxu0 %v2324_v57 }
 0x1fd   :  { %1899 = vmatprep.subr.bf16.mxu1 %v2336_v59 }
 0x1ff   :  { %1671 = vmatpush3.bf16.msra.mxu0 %v2329_v58 }
 0x200   :  { %1900 = vmatpush3.bf16.msra.mxu1 %v2336_v59  ;;  %1672 = vmatprep.subr.bf16.mxu0 %v2343_v60 }
 0x201   :  { %1901 = vmatprep.subr.bf16.mxu1 %v2355_v62 }
 0x203   :  { %1673 = vmatpush3.bf16.msra.mxu0 %v2348_v61 }
 0x204   :  { %1902 = vmatpush3.bf16.msra.mxu1 %v2355_v62  ;;  %1696 = vmatprep.subr.bf16.mxu0 %v2201_v31 }
 0x205   :  { %1903 = vmatprep.subr.bf16.mxu1 %v2364_v63 }
 0x208   :  { %1904 = vmatpush3.bf16.msra.mxu1 %v2364_v63 }
 0x209   :  { %1909 = vmatprep.subr.bf16.mxu1 %v2219_v37 }
 0x2b9   :  { %v1629_v5 = vpop.f32.mrb[24].mxu0 }
 0x2ba   :  { %v1630_v6 = vpop.f32.mrb[25].mxu0 }
 0x2bb   :  { %v1631_v7 = vadd.f32 %v1630_v6, %v1629_v5  ;;  %v1632_v8 = vpop.f32.mrb[26].mxu0 }
 0x2bc   :  { %v1633_v9 = vpop.f32.mrb[27].mxu0 }
 0x2bd   :  { %v1634_v10 = vadd.f32 %v1633_v9, %v1632_v8  ;;  %v804_v11 = vadd.f32 %v1631_v7, %v2414_v23 }
 0x2be   :  { %v860_v12 = vpop.f32.mrb[24].mxu1 }
 0x2bf   :  { %v861_v13 = vadd.f32 %v860_v12, %v804_v11  ;;  %v1879_v14 = vpop.f32.mrb[25].mxu1  ;;  %v807_v15 = vadd.f32 %v1634_v10, %v2414_v23 }
 0x2c0   :  { %v863_v16 = vpop.f32.mrb[26].mxu1 }
 0x2c1   :  { %v864_v17 = vadd.f32 %v863_v16, %v807_v15  ;;  %v1635_v18 = vpop.f32.mrb[28].mxu0  ;;  %v1880_v19 = vpop.f32.mrb[27].mxu1 }
 0x2c2   :  { %v1636_v3 = vpop.f32.mrb[29].mxu0 }
 0x2c3   :  { %v883_v20 = vmax.f32 %v861_v13, %v864_v17  ;;  %v1637_v21 = vadd.f32 %v1636_v3, %v1635_v18  ;;  %v1638_v22 = vpop.f32.mrb[30].mxu0 }
 0x2c4   :  { %v1639_v24 = vpop.f32.mrb[31].mxu0 }
 0x2c5   :  { %v1640_v25 = vadd.f32 %v1639_v24, %v1638_v22  ;;  %v812_v26 = vadd.f32 %v1637_v21, %v2414_v23  ;;  %v2478_v21 = vcombine.low %v2061_v27, %v2061_v27 }
 0x2c6   :  { %v868_v28 = vpop.f32.mrb[28].mxu1 }
 0x2c7   :  { %v869_v29 = vadd.f32 %v868_v28, %v812_v26  ;;  %v1883_v30 = vpop.f32.mrb[29].mxu1  ;;  %v815_v32 = vadd.f32 %v1640_v25, %v2414_v23 }
 0x2c8   :  { %v871_v33 = vpop.f32.mrb[30].mxu1 }
 0x2c9   :  { %v2464_v34 = vmax.f32 %v883_v20, %v869_v29  ;;  %v872_v38 = vadd.f32 %v871_v33, %v815_v32  ;;  %v1641_v39 = vpop.f32.mrb[32].mxu0  ;;  %v1884_v44 = vpop.f32.mrb[31].mxu1 }
 0x2ca   :  { %v1642_v45 = vpop.f32.mrb[33].mxu0 }
 0x2cb   :  { %v884_v48 = vmax.f32 %v869_v29, %v872_v38  ;;  %v1643_v51 = vadd.f32 %v1642_v45, %v1641_v39  ;;  %v1644_v0 = vpop.f32.mrb[34].mxu0  ;;  %v889_v6 = vmax.f32 %v2464_v34, 0.0 }
 0x2cc   :  { %v1645_v2 = vpop.f32.mrb[35].mxu0 }
 0x2cd   :  { %v1646_v4 = vadd.f32 %v1645_v2, %v1644_v0  ;;  %v820_v5 = vadd.f32 %v1643_v51, %v2414_v23  ;;  %v892_v15 = vpack.c.bf16 %v889_v6, %v889_v6 }
 0x2ce   :  { %v876_v7 = vpop.f32.mrb[32].mxu1 }
 0x2cf   :  { %v877_v8 = vadd.f32 %v876_v7, %v820_v5  ;;  %v1887_v9 = vpop.f32.mrb[33].mxu1  ;;  %v823_v10 = vadd.f32 %v1646_v4, %v2414_v23  ;;  %v1485_v3 = vcombine.low %v2061_v27, %v892_v15 }
 0x2d0   :  { %v879_v11 = vpop.f32.mrb[34].mxu1 }
 0x2d1   :  { %v2469_v12 = vmax.f32 %v884_v48, %v877_v8  ;;  %v880_v13 = vadd.f32 %v879_v11, %v823_v10  ;;  %v1888_v14 = vpop.f32.mrb[35].mxu1 }
 0x2d3   :  { %v890_v16 = vmax.f32 %v2469_v12, 0.0  ;;  %v885_v17 = vmax.f32 %v877_v8, %v880_v13 }
 0x2d5   :  { %v2472_v18 = vmax.f32 %v885_v17, 0.0  ;;  %v1515_v19 = vpack.c.bf16 %v890_v16, %v889_v6  ;;  %v1517_v25 = vpack.c.bf16 %v890_v16, %v890_v16 }
 0x2d7   :  { %v891_v20 = vmax.f32 %v2472_v18, 0.0  ;;  %945 = vmatprep.mubr.bf16.mxu0 %v1515_v19 }
 0x2d8   :  { %946 = vmatmul.mubr.bf16.vlgmr.msra.gmra.mrb[36].mxu0 %v1485_v3 }
 0x2d9   :  { %v1518_v22 = vpack.c.bf16 %v891_v20, %v891_v20  ;;  %v1516_v24 = vpack.c.bf16 %v891_v20, %v890_v16  ;;  %1697 = vmatpush3.bf16.msra.mxu0 %v2207_v35 }
 0x2da   :  { %1698 = vmatprep.subr.bf16.mxu0 %v2213_v36 }
 0x2db   :  { %953 = vmatprep.mubr.bf16.mxu0 %v1518_v22  ;;  %1905 = vmatprep.mubr.bf16.mxu1 %v1516_v24 }
 0x2dc   :  { %1906 = vmatmul.mubr.bf16.vlgmr.msra.gmra.mrb[36].mxu1 %v2478_v21 }
 0x2dd   :  { %1699 = vmatpush3.bf16.msra.mxu0 %v2230_v40  ;;  %1910 = vmatpush3.bf16.msra.mxu1 %v2219_v37 }
 0x2de   :  { %1700 = vmatprep.subr.bf16.mxu0 %v2238_v41  ;;  %1911 = vmatprep.subr.bf16.mxu1 %v2245_v42 }
 0x2e0   :  { %954 = vmatmul.mubr.bf16.gmra.mrb[40].mxu0 %v1517_v25 }
 0x2e1   :  { %1701 = vmatpush3.bf16.msra.mxu0 %v2250_v43  ;;  %1912 = vmatpush3.bf16.msra.mxu1 %v2245_v42 }
 0x2e2   :  { %1702 = vmatprep.subr.bf16.mxu0 %v2256_v46  ;;  %1913 = vmatprep.subr.bf16.mxu1 %v2261_v47 }
 0x2e5   :  { %1703 = vmatpush3.bf16.msra.mxu0 %v2272_v49  ;;  %1914 = vmatpush3.bf16.msra.mxu1 %v2261_v47 }
 0x2e6   :  { %1704 = vmatprep.subr.bf16.mxu0 %v2278_v50  ;;  %1915 = vmatprep.subr.bf16.mxu1 %v2298_v53 }
 0x2e9   :  { %1705 = vmatpush3.bf16.msra.mxu0 %v2293_v52  ;;  %1916 = vmatpush3.bf16.msra.mxu1 %v2298_v53 }
 0x2ea   :  { %1706 = vmatprep.subr.bf16.mxu0 %v2305_v54  ;;  %1917 = vmatprep.subr.bf16.mxu1 %v2317_v56 }
 0x2ed   :  { %1707 = vmatpush3.bf16.msra.mxu0 %v2310_v55  ;;  %1918 = vmatpush3.bf16.msra.mxu1 %v2317_v56 }
 0x2ee   :  { %1708 = vmatprep.subr.bf16.mxu0 %v2324_v57  ;;  %1919 = vmatprep.subr.bf16.mxu1 %v2336_v59 }
 0x2f1   :  { %1709 = vmatpush3.bf16.msra.mxu0 %v2329_v58  ;;  %1920 = vmatpush3.bf16.msra.mxu1 %v2336_v59 }
 0x2f2   :  { %1710 = vmatprep.subr.bf16.mxu0 %v2343_v60  ;;  %1921 = vmatprep.subr.bf16.mxu1 %v2355_v62 }
 0x2f5   :  { %1711 = vmatpush3.bf16.msra.mxu0 %v2348_v61  ;;  %1922 = vmatpush3.bf16.msra.mxu1 %v2355_v62 }
 0x2f6   :  { %1923 = vmatprep.subr.bf16.mxu1 %v2364_v63  ;;  %1734 = vmatprep.subr.bf16.mxu0 %v2201_v31 }
 0x2f9   :  { %1924 = vmatpush3.bf16.msra.mxu1 %v2364_v63 }
 0x2fa   :  { %1929 = vmatprep.subr.bf16.mxu1 %v2059_v1 }
 0x3ab   :  { %v1674_v26 = vpop.f32.mrb[36].mxu0 }
 0x3ac   :  { %v1675_v28 = vpop.f32.mrb[37].mxu0 }
 0x3ad   :  { %v1676_v29 = vadd.f32 %v1675_v28, %v1674_v26  ;;  %v1677_v30 = vpop.f32.mrb[38].mxu0 }
 0x3ae   :  { %v1678_v32 = vpop.f32.mrb[39].mxu0 }
 0x3af   :  { %v1679_v33 = vadd.f32 %v1678_v32, %v1677_v30  ;;  %v1907_v38 = vpop.f32.mrb[36].mxu1  ;;  %v948_v39 = vadd.f32 %v1676_v29, %v2414_v23 }
 0x3b0   :  { %v995_v44 = vpop.f32.mrb[37].mxu1 }
 0x3b1   :  { %v996_v45 = vadd.f32 %v995_v44, %v948_v39  ;;  %v1908_v48 = vpop.f32.mrb[38].mxu1  ;;  %v951_v51 = vadd.f32 %v1679_v33, %v2414_v23 }
 0x3b2   :  { %v998_v0 = vpop.f32.mrb[39].mxu1 }
 0x3b3   :  { %v1009_v2 = vmax.f32 %v996_v45, 0.0  ;;  %v999_v4 = vadd.f32 %v998_v0, %v951_v51  ;;  %v1680_v5 = vpop.f32.mrb[40].mxu0  ;;  %v2058_v51 = vld [vmem:[%s2650_s3 + $0x50] sm:$0xff]  }
 0x3b4   :  { %v1681_v6 = vpop.f32.mrb[41].mxu0 }
 0x3b5   :  { %v1012_v7 = vpack.c.bf16 %v1009_v2, %v1009_v2  ;;  %v1010_v8 = vmax.f32 %v999_v4, 0.0  ;;  %v1682_v9 = vadd.f32 %v1681_v6, %v1680_v5  ;;  %v1683_v10 = vpop.f32.mrb[42].mxu0  ;;  %v2049_v6 = vld [vmem:[%s2653_s5 + $0x10] sm:$0xff]  }
 0x3b6   :  { %v1684_v11 = vpop.f32.mrb[43].mxu0 }
 0x3b7   :  { %v1491_v13 = vcombine.low %v2061_v27, %v1012_v7  ;;  %v956_v14 = vadd.f32 %v1682_v9, %v2414_v23  ;;  %v1519_v15 = vpack.c.bf16 %v1010_v8, %v1009_v2  ;;  %v1521_v20 = vpack.c.bf16 %v1010_v8, %v1010_v8  ;;  %v2051_v7 = vld [vmem:[%s2653_s5 + $0x20] sm:$0xff]   ;;  %v2053_v11 = vld [vmem:[%s2653_s5 + $0x30] sm:$0xff]  }
 0x3b9   :  { %v1004_v16 = vadd.f32 %v1907_v38, %v956_v14  ;;  %1063 = vmatprep.mubr.bf16.mxu0 %v1519_v15  ;;  %v2054_v15 = vld [vmem:[%s2653_s5 + $0x38] sm:$0xff]  }
 0x3ba   :  { %1064 = vmatmul.mubr.bf16.vlgmr.msra.gmra.mrb[44].mxu0 %v1491_v13 }
 0x3bb   :  { %v1011_v17 = vmax.f32 %v1004_v16, 0.0  ;;  %1735 = vmatpush3.bf16.msra.mxu0 %v2207_v35 }
 0x3bc   :  { %1736 = vmatprep.subr.bf16.mxu0 %v2213_v36 }
 0x3bd   :  { %v1522_v19 = vpack.c.bf16 %v1011_v17, %v1011_v17  ;;  %v1520_v3 = vpack.c.bf16 %v1011_v17, %v1010_v8  ;;  %v2052_v8 = vld [vmem:[%s2653_s5 + $0x28] sm:$0xff]  }
 0x3bf   :  { %1071 = vmatprep.mubr.bf16.mxu0 %v1522_v19  ;;  %1925 = vmatprep.mubr.bf16.mxu1 %v1520_v3 }
 0x3c0   :  { %1926 = vmatmul.mubr.bf16.vlgmr.msra.gmra.mrb[40].mxu1 %v2478_v21  ;;  %1737 = vmatpush3.bf16.msra.mxu0 %v2230_v40 }
 0x3c1   :  { %1930 = vmatpush3.bf16.msra.mxu1 %v2219_v37  ;;  %1738 = vmatprep.subr.bf16.mxu0 %v2238_v41 }
 0x3c2   :  { %1072 = vmatmul.mubr.bf16.gmra.mrb[48].mxu0 %v1521_v20  ;;  %1931 = vmatprep.subr.bf16.mxu1 %v2059_v1 }
 0x3c3   :  { %1945 = vmatprep.mubr.msk.bf16.mxu1 %vm2060_vm0, %v2059_v1 }
 0x3c4   :  { %1739 = vmatpush3.bf16.msra.mxu0 %v2250_v43 }
 0x3c5   :  { %1932 = vmatpush3.bf16.msra.mxu1 %v2245_v42  ;;  %1740 = vmatprep.subr.bf16.mxu0 %v2256_v46 }
 0x3c6   :  { %1933 = vmatprep.subr.bf16.mxu1 %v2059_v1 }
 0x3c8   :  { %1741 = vmatpush3.bf16.msra.mxu0 %v2272_v49 }
 0x3c9   :  { %1934 = vmatpush3.bf16.msra.mxu1 %v2261_v47  ;;  %1742 = vmatprep.subr.bf16.mxu0 %v2278_v50 }
 0x3ca   :  { %1935 = vmatprep.subr.bf16.mxu1 %v2059_v1 }
 0x3cc   :  { %1743 = vmatpush3.bf16.msra.mxu0 %v2293_v52 }
 0x3cd   :  { %1936 = vmatpush3.bf16.msra.mxu1 %v2298_v53  ;;  %1744 = vmatprep.subr.bf16.mxu0 %v2305_v54 }
 0x3ce   :  { %1937 = vmatprep.subr.bf16.mxu1 %v2059_v1 }
 0x3d0   :  { %1745 = vmatpush3.bf16.msra.mxu0 %v2310_v55 }
 0x3d1   :  { %1938 = vmatpush3.bf16.msra.mxu1 %v2317_v56  ;;  %1746 = vmatprep.subr.bf16.mxu0 %v2324_v57 }
 0x3d2   :  { %1939 = vmatprep.subr.bf16.mxu1 %v2059_v1 }
 0x3d4   :  { %1747 = vmatpush3.bf16.msra.mxu0 %v2329_v58 }
 0x3d5   :  { %1940 = vmatpush3.bf16.msra.mxu1 %v2336_v59  ;;  %1748 = vmatprep.subr.bf16.mxu0 %v2343_v60 }
 0x3d6   :  { %1941 = vmatprep.subr.bf16.mxu1 %v2059_v1 }
 0x3d8   :  { %1749 = vmatpush3.bf16.msra.mxu0 %v2348_v61 }
 0x3d9   :  { %1942 = vmatpush3.bf16.msra.mxu1 %v2355_v62  ;;  %1765 = vmatprep.subr.bf16.mxu0 %v2201_v31 }
 0x3da   :  { %1943 = vmatprep.subr.bf16.mxu1 %v2059_v1 }
 0x3dd   :  { %1944 = vmatpush3.bf16.msra.mxu1 %v2364_v63 }
 0x3de   :  { %1949 = vmatprep.subr.bf16.mxu1 %v2059_v1 }
 0x3e0   :  { %1946 = vmatmul.mubr.bf16.vlgmr.msra.gmra.mrb[44].mxu1 %v2061_v27 }
 0x3e1   :  { %1950 = vmatpush3.bf16.msra.mxu1 %v2219_v37  ;;  %1965 = vmatprep.mubr.msk.bf16.mxu1 %vm2060_vm0, %v2059_v1 }
 0x3e2   :  { %1951 = vmatprep.subr.bf16.mxu1 %v2059_v1 }
 0x3e5   :  { %1952 = vmatpush3.bf16.msra.mxu1 %v2245_v42 }
 0x3e6   :  { %1953 = vmatprep.subr.bf16.mxu1 %v2059_v1 }
 0x3e9   :  { %1954 = vmatpush3.bf16.msra.mxu1 %v2261_v47 }
 0x3ea   :  { %1955 = vmatprep.subr.bf16.mxu1 %v2059_v1 }
 0x3ed   :  { %1956 = vmatpush3.bf16.msra.mxu1 %v2298_v53 }
 0x3ee   :  { %1957 = vmatprep.subr.bf16.mxu1 %v2059_v1 }
 0x3f1   :  { %1958 = vmatpush3.bf16.msra.mxu1 %v2317_v56 }
 0x3f2   :  { %1959 = vmatprep.subr.bf16.mxu1 %v2059_v1 }
 0x3f5   :  { %1960 = vmatpush3.bf16.msra.mxu1 %v2336_v59 }
 0x3f6   :  { %1961 = vmatprep.subr.bf16.mxu1 %v2059_v1 }
 0x3f9   :  { %1962 = vmatpush3.bf16.msra.mxu1 %v2355_v62 }
 0x3fa   :  { %1963 = vmatprep.subr.bf16.mxu1 %v2059_v1 }
 0x3fd   :  { %1964 = vmatpush3.bf16.msra.mxu1 %v2364_v63 }
 0x400   :  { %1966 = vmatmul.mubr.bf16.vlgmr.msra.gmra.mrb[48].mxu1 %v2061_v27 }
 0x48d   :  { %v1712_v31 = vpop.f32.mrb[44].mxu0 }
 0x48e   :  { %v1713_v35 = vpop.f32.mrb[45].mxu0 }
 0x48f   :  { %v1714_v36 = vadd.f32 %v1713_v35, %v1712_v31  ;;  %v1715_v37 = vpop.f32.mrb[46].mxu0 }
 0x490   :  { %v1716_v40 = vpop.f32.mrb[47].mxu0 }
 0x491   :  { %v1717_v41 = vadd.f32 %v1716_v40, %v1715_v37  ;;  %v1066_v47 = vadd.f32 %v1714_v36, %v2414_v23 }
 0x493   :  { %v1927_v42 = vpop.f32.mrb[40].mxu1  ;;  %v1069_v62 = vadd.f32 %v1717_v41, %v2414_v23 }
 0x494   :  { %v1113_v53 = vpop.f32.mrb[41].mxu1 }
 0x495   :  { %v1114_v56 = vadd.f32 %v1113_v53, %v1066_v47  ;;  %v1718_v59 = vpop.f32.mrb[48].mxu0  ;;  %v1928_v21 = vpop.f32.mrb[42].mxu1 }
 0x496   :  { %v1719_v22 = vpop.f32.mrb[49].mxu0  ;;  %v1116_v24 = vpop.f32.mrb[43].mxu1 }
 0x497   :  { %v1720_v63 = vadd.f32 %v1719_v22, %v1718_v59  ;;  %v1117_v25 = vadd.f32 %v1116_v24, %v1069_v62  ;;  %v1721_v26 = vpop.f32.mrb[50].mxu0  ;;  %v1127_v29 = vadd.f32 %v1114_v56, %v2464_v34  ;;  %v2055_v34 = vld [vmem:[%s2650_s3] sm:$0xff]  }
 0x498   :  { %v1722_v28 = vpop.f32.mrb[51].mxu0 }
 0x499   :  { %v1074_v30 = vadd.f32 %v1720_v63, %v2414_v23  ;;  %v1128_v32 = vadd.f32 %v1117_v25, %v2469_v12  ;;  %v2056_v12 = vld [vmem:[%s2650_s3 + $0x48] sm:$0xff]  }
 0x49b   :  { %v1122_v33 = vadd.f32 %v1927_v42, %v1074_v30  ;;  %v1130_v38 = vmax.f32 %v1127_v29, %v1128_v32 }
 0x49d   :  { %v1129_v39 = vadd.f32 %v1122_v33, %v2472_v18  ;;  %v2057_v18 = vld [vmem:[%s2650_s3 + $0x8] sm:$0xff]  }
 0x49f   :  { %v2577_v44 = vmax.f32 %v1130_v38, %v1129_v39 }
 0x4a1   :  { %v1132_v45 = vmax.f32 %v2577_v44, 0.0 }
 0x4a3   :  { %v1133_v48 = vpack.c.bf16 %v1132_v45, %v1132_v45 }
 0x4a5   :  { %1166 = vmatprep.mubr.bf16.mxu0 %v1133_v48 }
 0x4a6   :  { %1167 = vmatmul.mubr.bf16.vlgmr.msra.gmra.mrb[52].mxu0 %v2061_v27 }
 0x4a7   :  { %1766 = vmatpush3.bf16.msra.mxu0 %v2055_v34 }
 0x4a8   :  { %1767 = vmatprep.subr.bf16.mxu0 %v2056_v12 }
 0x4ab   :  { %1768 = vmatpush3.bf16.msra.mxu0 %v2057_v18 }
 0x4ac   :  { %1769 = vmatprep.subr.bf16.mxu0 %v2058_v51 }
 0x4af   :  { %1770 = vmatpush3.bf16.msra.mxu0 %v2250_v43 }
 0x4b0   :  { %1771 = vmatprep.subr.bf16.mxu0 %v2256_v46 }
 0x4b3   :  { %1772 = vmatpush3.bf16.msra.mxu0 %v2272_v49  ;;  %v1208_v43 = vpop.f32.mrb[44].mxu1 }
 0x4b4   :  { %1773 = vmatprep.subr.bf16.mxu0 %v2278_v50  ;;  %v1947_v46 = vpop.f32.mrb[45].mxu1 }
 0x4b5   :  { %v1211_v49 = vpop.f32.mrb[46].mxu1 }
 0x4b6   :  { %v1948_v50 = vpop.f32.mrb[47].mxu1 }
 0x4b7   :  { %1774 = vmatpush3.bf16.msra.mxu0 %v2293_v52 }
 0x4b8   :  { %1775 = vmatprep.subr.bf16.mxu0 %v2305_v54 }
 0x4bb   :  { %1776 = vmatpush3.bf16.msra.mxu0 %v2310_v55 }
 0x4bc   :  { %1777 = vmatprep.subr.bf16.mxu0 %v2324_v57 }
 0x4bf   :  { %1778 = vmatpush3.bf16.msra.mxu0 %v2329_v58 }
 0x4c0   :  { %1779 = vmatprep.subr.bf16.mxu0 %v2343_v60  ;;  %v2047_v60 = vld [vmem:[%s2653_s5] sm:$0xff]  }
 0x4c3   :  { %1780 = vmatpush3.bf16.msra.mxu0 %v2348_v61  ;;  %v2048_v61 = vld [vmem:[%s2653_s5 + $0x8] sm:$0xff]  }
 0x4c4   :  { %1969 = vmatprep.subr.bf16.mxu0 %v2059_v1 }
 0x4d3   :  { %v1290_v9 = vpop.f32.mrb[48].mxu1 }
 0x4d4   :  { %v1967_v10 = vpop.f32.mrb[49].mxu1 }
 0x4d5   :  { %v1293_v13 = vpop.f32.mrb[50].mxu1 }
 0x4d6   :  { %v1968_v14 = vpop.f32.mrb[51].mxu1 }
 0x579   :  { %v1750_v0 = vpop.f32.mrb[52].mxu0 }
 0x57a   :  { %v1751_v52 = vpop.f32.mrb[53].mxu0 }
 0x57b   :  { %v1752_v2 = vadd.f32 %v1751_v52, %v1750_v0  ;;  %v1753_v54 = vpop.f32.mrb[54].mxu0 }
 0x57c   :  { %v1754_v4 = vpop.f32.mrb[55].mxu0 }
 0x57d   :  { %v1169_v55 = vadd.f32 %v1752_v2, %v2414_v23 }
 0x57f   :  { %v1209_v57 = vadd.f32 %v1208_v43, %v1169_v55 }
 0x581   :  { %v1214_v5 = vmax.f32 %v1209_v57, 0.0 }
 0x583   :  { %v1215_v58 = vpack.c.bf16 %v1214_v5, %v1214_v5 }
 0x585   :  { %1248 = vmatprep.mubr.bf16.mxu0 %v1215_v58 }
 0x586   :  { %1249 = vmatmul.mubr.bf16.vlgmr.msra.gmra.mrb[56].mxu0 %v2061_v27  ;;  %v2050_v27 = vld [vmem:[%s2653_s5 + $0x18] sm:$0xff]  }
 0x587   :  { %1970 = vmatpush3.bf16.msra.mxu0 %v2047_v60  ;;  %1985 = vmatprep.mubr.msk.bf16.mxu0 %vm2060_vm0, %v2059_v1 }
 0x588   :  { %1971 = vmatprep.subr.bf16.mxu0 %v2059_v1 }
 0x58b   :  { %1972 = vmatpush3.bf16.msra.mxu0 %v2048_v61 }
 0x58c   :  { %1973 = vmatprep.subr.bf16.mxu0 %v2059_v1 }
 0x58f   :  { %1974 = vmatpush3.bf16.msra.mxu0 %v2049_v6 }
 0x590   :  { %1975 = vmatprep.subr.bf16.mxu0 %v2059_v1 }
 0x593   :  { %1976 = vmatpush3.bf16.msra.mxu0 %v2050_v27 }
 0x594   :  { %1977 = vmatprep.subr.bf16.mxu0 %v2059_v1 }
 0x597   :  { %1978 = vmatpush3.bf16.msra.mxu0 %v2051_v7 }
 0x598   :  { %1979 = vmatprep.subr.bf16.mxu0 %v2059_v1 }
 0x59b   :  { %1980 = vmatpush3.bf16.msra.mxu0 %v2052_v8 }
 0x59c   :  { %1981 = vmatprep.subr.bf16.mxu0 %v2059_v1 }
 0x59f   :  { %1982 = vmatpush3.bf16.msra.mxu0 %v2053_v11 }
 0x5a0   :  { %1983 = vmatprep.subr.bf16.mxu0 %v2059_v1  ;;  %v1496_v1 = vld [vmem:[%s2654_s6] ss:$0 sm:$0xff] }
 0x5a3   :  { %1984 = vmatpush3.bf16.msra.mxu0 %v2054_v15 }
 0x659   :  { %v1781_v16 = vpop.f32.mrb[56].mxu0 }
 0x65a   :  { %v1782_v17 = vpop.f32.mrb[57].mxu0 }
 0x65b   :  { %v1783_v19 = vadd.f32 %v1782_v17, %v1781_v16  ;;  %v1784_v3 = vpop.f32.mrb[58].mxu0 }
 0x65c   :  { %v1785_v20 = vpop.f32.mrb[59].mxu0 }
 0x65d   :  { %v1251_v31 = vadd.f32 %v1783_v19, %v2414_v23 }
 0x65f   :  { %v1291_v35 = vadd.f32 %v1290_v9, %v1251_v31 }
 0x661   :  { %v1296_v36 = vadd.f32 %v1291_v35, %v2577_v44 }
 0x663   :  { %v1297_v37 = vpack.c.bf16 %v1296_v36, %v1296_v36 }
 0x665   :  { %1986 = vmatmul.mubr.bf16.vlgmr.msra.gmra.mrb[60].mxu0 %v1297_v37 }
 0x738   :  { %v1403_v40 = vpop.f32.mrb[60].mxu0 }
 0x739   :  { %v1404_v41 = vadd.f32 %v1496_v1, %v1403_v40  ;;  %v1987_v42 = vpop.f32.mrb[61].mxu0 }
 0x73a   :  { %v1406_v47 = vpop.f32.mrb[62].mxu0 }
 0x73b   :  { %1409 = vst [vmem:[%s2655_s7] sm:$0xff] %v1404_v41  ;;  %v1988_v53 = vpop.f32.mrb[63].mxu0 }

</bundles_post_ra>
